<compile_context>
chip_gen: v5e
topology: v5e:2x2
jax: 0.10.0
libtpu: 0.0.40
codegen_flags: <defaults>
</compile_context>

<pallas_src>
import jax
import jax.numpy as jnp
from jax import lax
from jax.experimental import pallas as pl
from jax.experimental.pallas import tpu as pltpu

NEG_BIG = -1e30  # finite "-inf" so p*log(p) stays 0 (not NaN) at masked entries


# ----------------------------------------------------------------------------
# small in-kernel helpers (pure jnp, traced inside the kernel)
# ----------------------------------------------------------------------------
def _log_softmax_stats(scores):
  """scores: (B, N), N on lanes. Returns (log_probs (B,N), entropy (B,1))."""
  m = jnp.max(scores, axis=-1, keepdims=True)
  e = jnp.exp(scores - m)
  z = jnp.sum(e, axis=-1, keepdims=True)
  lp = scores - m - jnp.log(z)
  p = e / z
  ent = -jnp.sum(p * lp, axis=-1, keepdims=True)
  return lp, ent


def _argmax_lanes(z, lane_iota):
  """First index of the lane-wise max. z: (B, N) -> (B, 1) int32."""
  m = jnp.max(z, axis=-1, keepdims=True)
  n = z.shape[-1]
  return jnp.min(jnp.where(z >= m, lane_iota, n), axis=-1, keepdims=True)


# ----------------------------------------------------------------------------
# fused ActorNet kernel
# ----------------------------------------------------------------------------
def actor_kernel(x_ref, w_ref, g_ref, out_ref):
  B, N, D = x_ref.shape
  BN = B * N

  x = x_ref[...]                                   # (B, N, D), resident in VMEM
  xf = x.reshape(BN, D)                            # merge leading dims (free)

  # packed weight slab: rows [0:D] = [w1 | wq], row D = [b1 | w2^T], row D+1[0] = b2
  W = w_ref[...]                                   # (D+2, 2D)
  w1q = W[:D, :]                                   # (D, 2D)
  b1 = W[D:D + 1, :D]                              # (1, D)
  w2t = W[D:D + 1, D:]                             # (1, D)
  b2 = W[D + 1:D + 2, 0:1]                         # (1, 1)

  # ---- one MXU pass for both shared-LHS matmuls ----------------------------
  hq = jnp.dot(xf, w1q, preferred_element_type=jnp.float32)   # (BN, 2D)
  h = jnp.maximum(hq[:, :D] + b1, 0.0) + xf                   # ReLU + residual
  qall = jnp.tanh(hq[:, D:])                                  # (BN, D) act2 queries

  # step-1 scores, computed directly lane-dense as (B, N): no (BN,1) relayout
  s1 = jnp.sum(h.reshape(B, N, D) * w2t.reshape(1, 1, D), axis=-1) + b2  # (B, N)

  lane = lax.broadcasted_iota(jnp.int32, (B, N), 1)
  g = g_ref[...]                                   # (B, 2N) Gumbel noise
  g1 = g[:, :N]
  g2 = g[:, N:]

  # ---- step 1: softmax stats + Gumbel-max sample ----------------------------
  lp1, ent1 = _log_softmax_stats(s1)               # (B, N), (B, 1)
  a1 = _argmax_lanes(s1 + g1, lane)                # (B, 1) int32 sampled action
  hit1 = lane == a1                                # (B, N) one-hot mask
  lp1_sel = jnp.sum(jnp.where(hit1, lp1, 0.0), axis=-1, keepdims=True)   # (B, 1)

  # ---- step 2: query attention, previous node masked -------------------------
  # one-hot select the chosen node's query (one MXU op), then VPU mul + lane
  # reduce; no batched einsum / per-batch matmul unrolling.
  k_iota = lax.broadcasted_iota(jnp.int32, (B, BN), 1)
  b_iota = lax.broadcasted_iota(jnp.int32, (B, BN), 0)
  sel = jnp.where(k_iota == b_iota * N + a1, 1.0, 0.0)                   # (B, BN)
  q_sel = jnp.dot(sel, qall, preferred_element_type=jnp.float32)         # (B, D)
  s2 = jnp.sum(x * q_sel.reshape(B, 1, D), axis=-1)                      # (B, N)
  s2 = jnp.where(hit1, NEG_BIG, s2)                # mask the previously chosen node

  lp2, ent2 = _log_softmax_stats(s2)
  a2 = _argmax_lanes(s2 + g2, lane)                # (B, 1) int32
  hit2 = lane == a2
  lp2_sel = jnp.sum(jnp.where(hit2, lp2, 0.0), axis=-1, keepdims=True)   # (B, 1)

  # ---- single tiny writeback: [a1, a2, lp1, lp2, ent, 0, 0, 0] --------------
  out_ref[...] = jnp.concatenate(
      [a1.astype(jnp.float32), a2.astype(jnp.float32),
       lp1_sel, lp2_sel, ent1 + ent2,
       jnp.zeros((B, 3), jnp.float32)], axis=1)                          # (B, 8)


# ----------------------------------------------------------------------------
# pallas_call wrapper
# ----------------------------------------------------------------------------
def _actor_call(x, w_packed, gumbel):
  B, N, D = x.shape
  return pl.pallas_call(
      actor_kernel,
      grid=(1,),                            # whole batch in a single invocation
      in_specs=[
          pl.BlockSpec((B, N, D), lambda i: (0, 0, 0)),
          pl.BlockSpec(w_packed.shape, lambda i: (0, 0)),
          pl.BlockSpec((B, 2 * N), lambda i: (0, 0)),
      ],
      out_specs=pl.BlockSpec((B, 8), lambda i: (0, 0)),
      out_shape=jax.ShapeDtypeStruct((B, 8), jnp.float32),
      compiler_params=pltpu.CompilerParams(
          dimension_semantics=("arbitrary",)),
  )(x, w_packed, gumbel)


# ----------------------------------------------------------------------------
# params + forward (sampling path, known_action=None)
# ----------------------------------------------------------------------------
def init_actor_params(key, D):
  k1, k2, k3, k4, k5 = jax.random.split(key, 5)
  s = 1.0 / jnp.sqrt(D)
  return {
      # ResNetBlock (act1 head): Linear(D,D) -> ReLU -> (+x) -> Linear(D,1)
      "w1": jax.random.normal(k1, (D, D), jnp.float32) * s,
      "b1": jax.random.normal(k2, (1, D), jnp.float32) * s,
      "w2": jax.random.normal(k3, (D, 1), jnp.float32) * s,
      "b2": jax.random.normal(k4, (1, 1), jnp.float32) * s,
      # act2_query: Linear(D, D, bias=False), stored pre-transposed (in, out)
      "wq": jax.random.normal(k5, (D, D), jnp.float32) * s,
  }


def pack_actor_params(p):
  """One-time host-side packing: (D+2, 2D) lane-dense slab -> one weight DMA."""
  D = p["w1"].shape[0]
  slab = jnp.zeros((D + 2, 2 * D), jnp.float32)
  slab = slab.at[:D, :D].set(p["w1"])
  slab = slab.at[:D, D:].set(p["wq"])
  slab = slab.at[D, :D].set(p["b1"][0])
  slab = slab.at[D, D:].set(p["w2"][:, 0])
  slab = slab.at[D + 1, 0].set(p["b2"][0, 0])
  return slab


@jax.jit
def actor_net_forward(w_packed, input_feat, key):
  """Returns (acts (2,B) int32, log_probs (2,B) f32, entropy (B,) f32)."""
  B, N, _ = input_feat.shape
  # Gumbel-max sampling noise for both selection steps (one tiny external op;
  # pltpu.prng_seed has no CPU/interpret lowering so it cannot live in-kernel).
  gumbel = jax.random.gumbel(key, (B, 2 * N), jnp.float32)
  slab = _actor_call(input_feat, w_packed, gumbel)   # (B, 8)
  acts = slab[:, 0:2].T.astype(jnp.int32)            # (2, B)
  log_probs = slab[:, 2:4].T                         # (2, B)
  entropy = slab[:, 4]                               # (B,)
  return acts, log_probs, entropy


if __name__ == "__main__":
  B, N, D = 2, 8, 32          # batch, num_nodes, state_feature_size
  root = jax.random.PRNGKey(0)
  k_param, k_data, k_sample = jax.random.split(root, 3)

  params = init_actor_params(k_param, D)
  w_packed = pack_actor_params(params)
  input_feat = jax.random.normal(k_data, (B, N, D), jnp.float32)

  acts, log_probs, entropy = actor_net_forward(w_packed, input_feat, k_sample)
  jax.block_until_ready((acts, log_probs, entropy))

  assert acts.shape == (2, B) and acts.dtype == jnp.int32
  assert log_probs.shape == (2, B)
  assert entropy.shape == (B,)
  assert bool(jnp.all((acts >= 0) & (acts < N)))
  # second action must differ from first (masked)
  assert bool(jnp.all(acts[0] != acts[1]))
  assert bool(jnp.all(jnp.isfinite(log_probs)))
  assert bool(jnp.all(jnp.isfinite(entropy)))

  # ---- pure-JAX reference check of the fused kernel's math -----------------
  x = input_feat
  xf = x.reshape(B * N, D)
  h = jnp.maximum(xf @ params["w1"] + params["b1"], 0.0) + xf
  s1 = (h @ params["w2"] + params["b2"]).reshape(B, N)
  lp1 = jax.nn.log_softmax(s1, axis=-1)
  ent1 = -(jax.nn.softmax(s1, axis=-1) * lp1).sum(-1)

  a1 = acts[0]
  prev = x[jnp.arange(B), a1]
  q = jnp.tanh(prev @ params["wq"])
  s2 = (x * q[:, None, :]).sum(-1)
  s2 = s2.at[jnp.arange(B), a1].set(NEG_BIG)
  lp2 = jax.nn.log_softmax(s2, axis=-1)
  ent2 = -(jax.nn.softmax(s2, axis=-1) * lp2).sum(-1)

  lp1_sel = jnp.take_along_axis(lp1, a1[:, None], axis=-1)[:, 0]
  lp2_sel = jnp.take_along_axis(lp2, acts[1][:, None], axis=-1)[:, 0]

  assert bool(jnp.allclose(log_probs[0], lp1_sel, atol=2e-3))
  assert bool(jnp.allclose(log_probs[1], lp2_sel, atol=2e-3))
  assert bool(jnp.allclose(entropy, ent1 + ent2, atol=2e-3))

  print("KERNEL_OK")
</pallas_src>

<mosaic_0001>
module attributes {stable_mosaic.version = 11 : i64} {
  func.func @actor_kernel(%arg0: i32, %arg1: memref<2x8x32xf32, #tpu.memory_space<vmem>>, %arg2: memref<34x64xf32, #tpu.memory_space<vmem>>, %arg3: memref<2x16xf32, #tpu.memory_space<vmem>>, %arg4: memref<2x8xf32, #tpu.memory_space<vmem>>) attributes {dimension_semantics = [#tpu.dimension_semantics<arbitrary>], iteration_bounds = array<i64: 1>, scalar_prefetch = 0 : i64, scratch_operands = 0 : i64, tpu.core_type = #tpu.core_type<tc>, window_params = [{pipeline_mode = #tpu.pipeline_mode<synchronous>, transform_indices = @transform_0, window_bounds = array<i64: 2, 8, 32>}, {pipeline_mode = #tpu.pipeline_mode<synchronous>, transform_indices = @transform_1, window_bounds = array<i64: 34, 64>}, {pipeline_mode = #tpu.pipeline_mode<synchronous>, transform_indices = @transform_2, window_bounds = array<i64: 2, 16>}, {pipeline_mode = #tpu.pipeline_mode<synchronous>, transform_indices = @transform_3, window_bounds = array<i64: 2, 8>}]} {
    %c0 = arith.constant 0 : index
    %c0_0 = arith.constant 0 : index
    %c0_1 = arith.constant 0 : index
    %0 = vector.load %arg1[%c0, %c0_0, %c0_1] : memref<2x8x32xf32, #tpu.memory_space<vmem>>, vector<2x8x32xf32>
    %1 = vector.shape_cast %0 : vector<2x8x32xf32> to vector<16x32xf32>
    %c0_2 = arith.constant 0 : index
    %c0_3 = arith.constant 0 : index
    %2 = vector.load %arg2[%c0_2, %c0_3] : memref<34x64xf32, #tpu.memory_space<vmem>>, vector<34x64xf32>
    %3 = vector.extract_strided_slice %2 {offsets = [0, 0], sizes = [32, 64], strides = [1, 1]} : vector<34x64xf32> to vector<32x64xf32>
    %4 = vector.extract_strided_slice %2 {offsets = [32, 0], sizes = [1, 32], strides = [1, 1]} : vector<34x64xf32> to vector<1x32xf32>
    %5 = vector.extract_strided_slice %2 {offsets = [32, 32], sizes = [1, 32], strides = [1, 1]} : vector<34x64xf32> to vector<1x32xf32>
    %6 = vector.extract_strided_slice %2 {offsets = [33, 0], sizes = [1, 1], strides = [1, 1]} : vector<34x64xf32> to vector<1x1xf32>
    %cst = arith.constant dense<0.000000e+00> : vector<16x64xf32>
    %7 = tpu.matmul %1, %3, %cst {dimension_numbers = #tpu.dot_dimension_numbers<[1], [0], [0], [1], [0, 0, 1, 1], [], []>} : vector<16x32xf32>, vector<32x64xf32>, vector<16x64xf32> -> vector<16x64xf32>
    %8 = vector.extract_strided_slice %7 {offsets = [0, 0], sizes = [16, 32], strides = [1, 1]} : vector<16x64xf32> to vector<16x32xf32>
    %9 = vector.broadcast %4 : vector<1x32xf32> to vector<16x32xf32>
    %10 = arith.addf %8, %9 : vector<16x32xf32>
    %cst_4 = arith.constant 0.000000e+00 : f32
    %11 = vector.broadcast %cst_4 : f32 to vector<16x32xf32>
    %12 = arith.maximumf %10, %11 : vector<16x32xf32>
    %13 = arith.addf %12, %1 : vector<16x32xf32>
    %14 = vector.extract_strided_slice %7 {offsets = [0, 32], sizes = [16, 32], strides = [1, 1]} : vector<16x64xf32> to vector<16x32xf32>
    %15 = math.tanh %14 : vector<16x32xf32>
    %16 = vector.shape_cast %13 : vector<16x32xf32> to vector<2x8x32xf32>
    %17 = vector.shape_cast %5 : vector<1x32xf32> to vector<1x1x32xf32>
    %18 = vector.broadcast %17 : vector<1x1x32xf32> to vector<2x8x32xf32>
    %19 = arith.mulf %16, %18 : vector<2x8x32xf32>
    %cst_5 = arith.constant dense<0.000000e+00> : vector<2x8xf32>
    %20 = vector.multi_reduction <add>, %19, %cst_5 [2] : vector<2x8x32xf32> to vector<2x8xf32>
    %21 = vector.broadcast %6 : vector<1x1xf32> to vector<2x8xf32>
    %22 = arith.addf %20, %21 : vector<2x8xf32>
    %23 = tpu.iota {dimensions = array<i32: 1>} : vector<2x8xi32>
    %c0_6 = arith.constant 0 : index
    %c0_7 = arith.constant 0 : index
    %24 = vector.load %arg3[%c0_6, %c0_7] : memref<2x16xf32, #tpu.memory_space<vmem>>, vector<2x16xf32>
    %25 = vector.extract_strided_slice %24 {offsets = [0, 0], sizes = [2, 8], strides = [1, 1]} : vector<2x16xf32> to vector<2x8xf32>
    %26 = vector.extract_strided_slice %24 {offsets = [0, 8], sizes = [2, 8], strides = [1, 1]} : vector<2x16xf32> to vector<2x8xf32>
    %cst_8 = arith.constant dense<0xFF800000> : vector<2xf32>
    %27 = vector.multi_reduction <maximumf>, %22, %cst_8 [1] : vector<2x8xf32> to vector<2xf32>
    %28 = vector.shape_cast %27 : vector<2xf32> to vector<2x1xf32>
    %29 = vector.broadcast %28 : vector<2x1xf32> to vector<2x8xf32>
    %30 = arith.subf %22, %29 : vector<2x8xf32>
    %31 = math.exp %30 : vector<2x8xf32>
    %cst_9 = arith.constant dense<0.000000e+00> : vector<2xf32>
    %32 = vector.multi_reduction <add>, %31, %cst_9 [1] : vector<2x8xf32> to vector<2xf32>
    %33 = vector.shape_cast %32 : vector<2xf32> to vector<2x1xf32>
    %34 = vector.broadcast %28 : vector<2x1xf32> to vector<2x8xf32>
    %35 = arith.subf %22, %34 : vector<2x8xf32>
    %36 = math.log %33 : vector<2x1xf32>
    %37 = vector.broadcast %36 : vector<2x1xf32> to vector<2x8xf32>
    %38 = arith.subf %35, %37 : vector<2x8xf32>
    %39 = vector.broadcast %33 : vector<2x1xf32> to vector<2x8xf32>
    %40 = arith.divf %31, %39 : vector<2x8xf32>
    %41 = arith.mulf %40, %38 : vector<2x8xf32>
    %cst_10 = arith.constant dense<0.000000e+00> : vector<2xf32>
    %42 = vector.multi_reduction <add>, %41, %cst_10 [1] : vector<2x8xf32> to vector<2xf32>
    %43 = vector.shape_cast %42 : vector<2xf32> to vector<2x1xf32>
    %cst_11 = arith.constant 0.000000e+00 : f32
    %44 = vector.broadcast %cst_11 : f32 to vector<2x1xf32>
    %45 = arith.subf %44, %43 : vector<2x1xf32>
    %46 = arith.addf %22, %25 : vector<2x8xf32>
    %cst_12 = arith.constant dense<0xFF800000> : vector<2xf32>
    %47 = vector.multi_reduction <maximumf>, %46, %cst_12 [1] : vector<2x8xf32> to vector<2xf32>
    %48 = vector.shape_cast %47 : vector<2xf32> to vector<2x1xf32>
    %49 = vector.broadcast %48 : vector<2x1xf32> to vector<2x8xf32>
    %50 = arith.cmpf oge, %46, %49 : vector<2x8xf32>
    %c8_i32 = arith.constant 8 : i32
    %51 = vector.broadcast %c8_i32 : i32 to vector<2x8xi32>
    %52 = arith.select %50, %23, %51 : vector<2x8xi1>, vector<2x8xi32>
    %cst_13 = arith.constant dense<2147483647> : vector<2xi32>
    %53 = vector.multi_reduction <minsi>, %52, %cst_13 [1] : vector<2x8xi32> to vector<2xi32>
    %54 = vector.shape_cast %53 : vector<2xi32> to vector<2x1xi32>
    %55 = vector.broadcast %54 : vector<2x1xi32> to vector<2x8xi32>
    %56 = arith.cmpi eq, %23, %55 : vector<2x8xi32>
    %cst_14 = arith.constant 0.000000e+00 : f32
    %57 = vector.broadcast %cst_14 : f32 to vector<2x8xf32>
    %58 = arith.select %56, %38, %57 : vector<2x8xi1>, vector<2x8xf32>
    %cst_15 = arith.constant dense<0.000000e+00> : vector<2xf32>
    %59 = vector.multi_reduction <add>, %58, %cst_15 [1] : vector<2x8xf32> to vector<2xf32>
    %60 = vector.shape_cast %59 : vector<2xf32> to vector<2x1xf32>
    %61 = tpu.iota {dimensions = array<i32: 1>} : vector<2x16xi32>
    %62 = tpu.iota {dimensions = array<i32: 0>} : vector<2x16xi32>
    %c8_i32_16 = arith.constant 8 : i32
    %63 = vector.broadcast %c8_i32_16 : i32 to vector<2x16xi32>
    %64 = arith.muli %62, %63 : vector<2x16xi32>
    %65 = vector.broadcast %54 : vector<2x1xi32> to vector<2x16xi32>
    %66 = arith.addi %64, %65 : vector<2x16xi32>
    %67 = arith.cmpi eq, %61, %66 : vector<2x16xi32>
    %cst_17 = arith.constant 1.000000e+00 : f32
    %cst_18 = arith.constant 0.000000e+00 : f32
    %68 = vector.broadcast %cst_17 : f32 to vector<2x16xf32>
    %69 = vector.broadcast %cst_18 : f32 to vector<2x16xf32>
    %70 = arith.select %67, %68, %69 : vector<2x16xi1>, vector<2x16xf32>
    %cst_19 = arith.constant dense<0.000000e+00> : vector<2x32xf32>
    %71 = tpu.matmul %70, %15, %cst_19 {dimension_numbers = #tpu.dot_dimension_numbers<[1], [0], [0], [1], [0, 0, 1, 1], [], []>} : vector<2x16xf32>, vector<16x32xf32>, vector<2x32xf32> -> vector<2x32xf32>
    %72 = vector.shape_cast %71 : vector<2x32xf32> to vector<2x1x32xf32>
    %73 = vector.broadcast %72 : vector<2x1x32xf32> to vector<2x8x32xf32>
    %74 = arith.mulf %0, %73 : vector<2x8x32xf32>
    %cst_20 = arith.constant dense<0.000000e+00> : vector<2x8xf32>
    %75 = vector.multi_reduction <add>, %74, %cst_20 [2] : vector<2x8x32xf32> to vector<2x8xf32>
    %cst_21 = arith.constant -1.000000e+30 : f32
    %76 = vector.broadcast %cst_21 : f32 to vector<2x8xf32>
    %77 = arith.select %56, %76, %75 : vector<2x8xi1>, vector<2x8xf32>
    %cst_22 = arith.constant dense<0xFF800000> : vector<2xf32>
    %78 = vector.multi_reduction <maximumf>, %77, %cst_22 [1] : vector<2x8xf32> to vector<2xf32>
    %79 = vector.shape_cast %78 : vector<2xf32> to vector<2x1xf32>
    %80 = vector.broadcast %79 : vector<2x1xf32> to vector<2x8xf32>
    %81 = arith.subf %77, %80 : vector<2x8xf32>
    %82 = math.exp %81 : vector<2x8xf32>
    %cst_23 = arith.constant dense<0.000000e+00> : vector<2xf32>
    %83 = vector.multi_reduction <add>, %82, %cst_23 [1] : vector<2x8xf32> to vector<2xf32>
    %84 = vector.shape_cast %83 : vector<2xf32> to vector<2x1xf32>
    %85 = vector.broadcast %79 : vector<2x1xf32> to vector<2x8xf32>
    %86 = arith.subf %77, %85 : vector<2x8xf32>
    %87 = math.log %84 : vector<2x1xf32>
    %88 = vector.broadcast %87 : vector<2x1xf32> to vector<2x8xf32>
    %89 = arith.subf %86, %88 : vector<2x8xf32>
    %90 = vector.broadcast %84 : vector<2x1xf32> to vector<2x8xf32>
    %91 = arith.divf %82, %90 : vector<2x8xf32>
    %92 = arith.mulf %91, %89 : vector<2x8xf32>
    %cst_24 = arith.constant dense<0.000000e+00> : vector<2xf32>
    %93 = vector.multi_reduction <add>, %92, %cst_24 [1] : vector<2x8xf32> to vector<2xf32>
    %94 = vector.shape_cast %93 : vector<2xf32> to vector<2x1xf32>
    %cst_25 = arith.constant 0.000000e+00 : f32
    %95 = vector.broadcast %cst_25 : f32 to vector<2x1xf32>
    %96 = arith.subf %95, %94 : vector<2x1xf32>
    %97 = arith.addf %77, %26 : vector<2x8xf32>
    %cst_26 = arith.constant dense<0xFF800000> : vector<2xf32>
    %98 = vector.multi_reduction <maximumf>, %97, %cst_26 [1] : vector<2x8xf32> to vector<2xf32>
    %99 = vector.shape_cast %98 : vector<2xf32> to vector<2x1xf32>
    %100 = vector.broadcast %99 : vector<2x1xf32> to vector<2x8xf32>
    %101 = arith.cmpf oge, %97, %100 : vector<2x8xf32>
    %c8_i32_27 = arith.constant 8 : i32
    %102 = vector.broadcast %c8_i32_27 : i32 to vector<2x8xi32>
    %103 = arith.select %101, %23, %102 : vector<2x8xi1>, vector<2x8xi32>
    %cst_28 = arith.constant dense<2147483647> : vector<2xi32>
    %104 = vector.multi_reduction <minsi>, %103, %cst_28 [1] : vector<2x8xi32> to vector<2xi32>
    %105 = vector.shape_cast %104 : vector<2xi32> to vector<2x1xi32>
    %106 = vector.broadcast %105 : vector<2x1xi32> to vector<2x8xi32>
    %107 = arith.cmpi eq, %23, %106 : vector<2x8xi32>
    %cst_29 = arith.constant 0.000000e+00 : f32
    %108 = vector.broadcast %cst_29 : f32 to vector<2x8xf32>
    %109 = arith.select %107, %89, %108 : vector<2x8xi1>, vector<2x8xf32>
    %cst_30 = arith.constant dense<0.000000e+00> : vector<2xf32>
    %110 = vector.multi_reduction <add>, %109, %cst_30 [1] : vector<2x8xf32> to vector<2xf32>
    %111 = vector.shape_cast %110 : vector<2xf32> to vector<2x1xf32>
    %112 = arith.sitofp %54 : vector<2x1xi32> to vector<2x1xf32>
    %113 = arith.sitofp %105 : vector<2x1xi32> to vector<2x1xf32>
    %114 = arith.addf %45, %96 : vector<2x1xf32>
    %cst_31 = arith.constant 0.000000e+00 : f32
    %115 = vector.broadcast %cst_31 : f32 to vector<2x3xf32>
    %116 = tpu.concatenate %112, %113, %60, %111, %114, %115 in 1 : vector<2x1xf32>, vector<2x1xf32>, vector<2x1xf32>, vector<2x1xf32>, vector<2x1xf32>, vector<2x3xf32> -> vector<2x8xf32>
    %c0_32 = arith.constant 0 : index
    %c0_33 = arith.constant 0 : index
    %117 = vector.load %arg4[%c0_32, %c0_33] : memref<2x8xf32, #tpu.memory_space<vmem>>, vector<2x8xf32>
    tpu.vector_store %arg4[%c0_32, %c0_33], %116 {strides = array<i32>} : memref<2x8xf32, #tpu.memory_space<vmem>>, vector<2x8xf32>,
    return
  }
  func.func @transform_0(%arg0: i32) -> (i32, i32, i32) {
    %c0_i32 = arith.constant 0 : i32
    %c0_i32_0 = arith.constant 0 : i32
    %c0_i32_1 = arith.constant 0 : i32
    %c0_i32_2 = arith.constant 0 : i32
    return %c0_i32, %c0_i32_0, %c0_i32_1 : i32, i32, i32
  }
  func.func @transform_1(%arg0: i32) -> (i32, i32) {
    %c0_i32 = arith.constant 0 : i32
    %c0_i32_0 = arith.constant 0 : i32
    %c0_i32_1 = arith.constant 0 : i32
    return %c0_i32, %c0_i32_0 : i32, i32
  }
  func.func @transform_2(%arg0: i32) -> (i32, i32) {
    %c0_i32 = arith.constant 0 : i32
    %c0_i32_0 = arith.constant 0 : i32
    %c0_i32_1 = arith.constant 0 : i32
    return %c0_i32, %c0_i32_0 : i32, i32
  }
  func.func @transform_3(%arg0: i32) -> (i32, i32) {
    %c0_i32 = arith.constant 0 : i32
    %c0_i32_0 = arith.constant 0 : i32
    %c0_i32_1 = arith.constant 0 : i32
    return %c0_i32, %c0_i32_0 : i32, i32
  }
}

</mosaic_0001>

<bundles_post_ra>
// kernel: actor_net_forward.1
= control target key start
LH: loop header
LB: loop body
LE: loop exit
PB: predicated region body
PF: predicated region fallthrough
CT: control target
= control target key end

     0   :  { %8 = vsyncpa [#allocation3], 0  ;;  %s498_s15 = smov [#allocation2]   ;;  %s499_s17 = smov 128   ;;  %s647_s0 = inlined_call_operand.vmem [shape: f32[2,8,32], index: 0, kind: input, shape index: {}]   ;;  %s648_s1 = inlined_call_operand.hbm [shape: f32[34,64], index: 1, kind: input, shape index: {}]   ;;  %s649_s2 = inlined_call_operand.vmem [shape: f32[2,16], index: 2, kind: input, shape index: {}]   ;;  %s650_s3 = inlined_call_operand.vmem [shape: f32[2,8], index: 3, kind: output, shape index: {}]  }
   0x1   :  { %s15_s14 = sshll.u32 %s648_s1, 4  ;;  %s17_s16 = sshll.u32 %s498_s15, 4  ;;  %s16_s14 = int_to_ptr.hbm [resolvable:$true] %s15_s14  ;;  %s18_s16 = int_to_ptr.vmem [resolvable:$true] %s17_s16 }
   0x2   :  { %s500_s18 = smov 8  }
   0x3   :  { %23 = dma.hbm_to_vmem [thread:$0]  %s16_s14, 640, %s18_s16, [#allocation3], %s499_s17, %s499_s17, %s500_s18  }
   0x4   :  { %496 = dma.done.wait [#allocation3], 640  }
   0x5   :  { %497 = vsyncadd [#allocation3], 4294966656  ;;  %v35_v0 = vld [vmem:[#allocation2 + $0x18] sm:$0xff]  ;;  %v34_v1 = vld [vmem:[#allocation2 + $0x10] sm:$0xff]  ;;  %vm37_vm0 = vcmask 261120   ;;  %s501_s22 = smov 96   ;;  %v95_v8 = vlaneseq }
   0x6   :  { %429 = vmatpush.msra.mxu2 %v35_v0  ;;  %56 = vmatpush.msra.mxu0 %v35_v0  ;;  %v33_v2 = vld [vmem:[#allocation2 + $0x8] sm:$0xff]  ;;  %v36_v3 = vld [vmem:[#allocation2 + $0x20] sm:$0x3]  ;;  %v502_v31 = vmov 0   ;;  %vm102_vm1 = vcmask 1041409   ;;  %vm105_vm2 = vcmask 58368  }
   0x7   :  { %v67_v4 = vperm.slane %v36_v3, 0  ;;  %v32_v5 = vld [vmem:[#allocation2] sm:$0xff]  ;;  %v531_v6 = vld [vmem:[%s647_s0 + $0x8] sm:$0xff]  ;;  %v543_v9 = vshrl.u32 %v95_v8, 7  ;;  %v89_v28 = vrot.slane %v36_v3, 1  ;;  %v561_v30 = vand.u32 127, %v95_v8  ;;  %451 = vset.pattern.permute.xlu0 %v502_v31 }
   0x8   :  { %430 = vmatpush.msra.mxu2 %v34_v1  ;;  %57 = vmatpush.msra.mxu0 %v34_v1  ;;  %v536_v7 = vld [vmem:[%s647_s0] sm:$0xff]  ;;  %vm301_vm6 = vcmask 130048   ;;  %s504_s24 = smov 120  }
   0x9   :  { %77 = vrot.lane.b32.xlu0 %v67_v4, %s501_s22  ;;  %442 = vset.pattern.permute.xlu1 %v543_v9  ;;  %v551_v18 = vld [vmem:[%s649_s2] sm:$0x3]  ;;  %433 = vpush %v89_v28 }
   0xa   :  { %431 = vmatpush.msra.mxu2 %v33_v2  ;;  %58 = vmatpush.msra.mxu0 %v33_v2  ;;  %v205_v21 = vperm.slane %v551_v18, 1  ;;  %v198_v29 = vperm.slane %v551_v18, 0 }
   0xb   :  { %443 = vset.pattern.permute.xlu2 %v543_v9 }
   0xc   :  { %432 = vmatpush.msra.mxu2 %v32_v5  ;;  %59 = vmatpush.msra.mxu0 %v32_v5 }
   0xd   :  { %427 = vmatmul.msk.f32.vlgmr.msra.gmra.mxu2 %vm37_vm0, %v531_v6  ;;  %426 = vmatmul.msk.f32.vlgmr.msra.gmra.mxu0 %vm37_vm0, %v536_v7 }
  0x13   :  { %210 = vperm.xlu2 %443, %v205_v21   ;;  %v289_v21 = vmul.u32 8, %v543_v9 }
  0x1b   :  { %444 = vset.pattern.permute.xlu2 %v502_v31 }
  0x3a   :  { %s434_s2 = spop %433 }
  0x3b   :  { %v91_v33 = vstv %s434_s2 }
  0x6d   :  { %v211_v39 = vpop.permute.xlu2 %210 }
  0x7b   :  { %v78_v13 = vpop.permute.xlu0 %77 }
  0x8a   :  { %v61_v10 = vpop.f32.mrf.mxu0 }
  0x8b   :  { %v68_v11 = vadd.f32 %v67_v4, %v61_v10  ;;  %452 = vtanh.f32 %v61_v10 }
  0x8d   :  { %v70_v12 = vmax.f32 %v68_v11, 0.0 }
  0x8f   :  { %v72_v14 = vadd.f32 %v70_v12, %v536_v7 }
  0x90   :  { %v64_v15 = vpop.f32.mrf.mxu2 }
  0x91   :  { %v69_v16 = vadd.f32 %v67_v4, %v64_v15  ;;  %454 = vtanh.f32 %v64_v15  ;;  %v80_v17 = vmul.f32 %v78_v13, %v72_v14  ;;  %v555_v22 = vpop.eup %452 }
  0x93   :  { %v71_v19 = vmax.f32 %v69_v16, 0.0  ;;  %v82_v20 = vsel %vm37_vm0, %v80_v17, 0.0 }
  0x94   :  { %83 = vadd.xlane.f32.xlu0 %v82_v20 }
  0x95   :  { %v73_v23 = vadd.f32 %v71_v19, %v531_v6 }
  0x97   :  { %v455_v24 = vpop.eup %454  ;;  %v81_v25 = vmul.f32 %v78_v13, %v73_v23 }
  0x98   :  { %v446_v26 = vpack.i.bf16 %v555_v22, %v455_v24  ;;  %v503_v24 = vmov 0.0  }
  0x99   :  { %v85_v27 = vsel %vm37_vm0, %v81_v25, 0.0 }
  0x9a   :  { %86 = vadd.xlane.f32.xlu1 %v85_v27 }
  0xb3   :  { %203 = vperm.xlu1 %442, %v198_v29  }
  0xbb   :  { %242 = vperm.xlu1 %442, %v561_v30  }
  0xc3   :  { %445 = vset.pattern.permute.xlu1 %v502_v31 }
 0x107   :  { %v84_v34 = vpop.xlane.xlu0 %83 }
 0x108   :  { %v93_v35 = vadd.f32 %v91_v33, %v84_v34 }
 0x10a   :  { %v100_v48 = vperm.slane %v93_v35, %v561_v30 }
 0x10d   :  { %v87_v32 = vpop.xlane.xlu1 %86 }
 0x10e   :  { %v564_v38 = vadd.f32 %v91_v33, %v87_v32 }
 0x110   :  { %v215_v40 = vadd.f32 %v211_v39, %v564_v38  ;;  %v101_v47 = vperm.slane %v564_v38, %v561_v30 }
 0x112   :  { %v103_v49 = vsel %vm102_vm1, %v101_v47, %v100_v48 }
 0x113   :  { %v106_v50 = vsel %vm105_vm2, %v103_v49, -inf }
 0x125   :  { %v204_v36 = vpop.permute.xlu1 %203 }
 0x126   :  { %v214_v37 = vadd.f32 %v204_v36, %v93_v35 }
 0x128   :  { %219 = vperm.xlu2 %444, %v214_v37  }
 0x12d   :  { %v243_v53 = vpop.permute.xlu1 %242 }
 0x130   :  { %222 = vperm.xlu2 %444, %v215_v40  }
 0x182   :  { %v220_v41 = vpop.permute.xlu2 %219 }
 0x183   :  { %v224_v43 = vperm.slane %v220_v41, %v561_v30 }
 0x18a   :  { %v223_v42 = vpop.permute.xlu2 %222 }
 0x18b   :  { %v225_v44 = vperm.slane %v223_v42, %v561_v30 }
 0x18d   :  { %v226_v45 = vsel %vm102_vm1, %v225_v44, %v224_v43 }
 0x18e   :  { %v228_v46 = vsel %vm105_vm2, %v226_v45, -inf }
 0x18f   :  { %229 = vmax.xlane.f32.xlu2 %v228_v46 }
 0x197   :  { %107 = vmax.xlane.f32.xlu2 %v106_v50 }
 0x202   :  { %v230_v51 = vpop.xlane.xlu2 %229 }
 0x203   :  { %v232_v52 = vperm.slane %v230_v51, 0  ;;  %v233_v55 = vperm.slane %v230_v51, 1 }
 0x205   :  { %vm236_vm3 = vcmp.ge.f32.partialorder %v214_v37, %v232_v52  ;;  %vm237_vm4 = vcmp.ge.f32.partialorder %v215_v40, %v233_v55 }
 0x206   :  { %v244_v54 = vsel %vm236_vm3, %v243_v53, 8  ;;  %v245_v56 = vsel %vm237_vm4, %v243_v53, 8 }
 0x207   :  { %247 = vperm.xlu1 %445, %v244_v54  }
 0x20a   :  { %v108_v5 = vpop.xlane.xlu2 %107 }
 0x20b   :  { %v110_v8 = vperm.slane %v108_v5, 0  ;;  %v111_v34 = vperm.slane %v108_v5, 1 }
 0x20d   :  { %v581_v10 = vsub.f32 %v93_v35, %v110_v8  ;;  %v597_v35 = vsub.f32 %v564_v38, %v111_v34 }
 0x20f   :  { %250 = vperm.xlu1 %445, %v245_v56   ;;  %v116_v11 = vmul.f32 1.442695, %v581_v10  ;;  %v118_v36 = vmul.f32 1.442695, %v597_v35 }
 0x211   :  { %456 = vpow2.f32 %v116_v11 }
 0x212   :  { %458 = vpow2.f32 %v118_v36 }
 0x217   :  { %v584_v15 = vpop.eup %456 }
 0x218   :  { %v601_v37 = vpop.eup %458 }
 0x279   :  { %v248_v57 = vpop.permute.xlu1 %247 }
 0x27a   :  { %v252_v59 = vperm.slane %v248_v57, %v561_v30 }
 0x281   :  { %v251_v58 = vpop.permute.xlu1 %250 }
 0x282   :  { %v253_v60 = vperm.slane %v251_v58, %v561_v30 }
 0x284   :  { %v254_v61 = vsel %vm102_vm1, %v253_v60, %v252_v59 }
 0x285   :  { %v255_v62 = vsel %vm105_vm2, %v254_v61, 2147483647 }
 0x286   :  { %v257_v63 = vshra.s32 %v255_v62, 16  ;;  %v256_v1 = vand.u32 65535, %v255_v62 }
 0x288   :  { %v259_v0 = vcvt.s32.f32 %v257_v63  ;;  %v258_v3 = vcvt.s32.f32 %v256_v1 }
 0x28a   :  { %260 = vmin.xlane.f32.xlu0 %v259_v0 }
 0x29e   :  { %447 = vrot.lane.b32.xlu0 %v446_v26, %s501_s22 }
 0x2fd   :  { %v261_v2 = vpop.xlane.xlu0 %260 }
 0x2fe   :  { %vm262_vm5 = vcmp.eq.f32.partialorder %v259_v0, %v261_v2  ;;  %v267_v16 = vcvt.f32.s32 %v261_v2 }
 0x2ff   :  { %v263_v4 = vsel %vm262_vm5, %v258_v3, inf }
 0x300   :  { %264 = vmin.xlane.f32.xlu1 %v263_v4  ;;  %v268_v19 = vshll.u32 %v267_v16, 16 }
 0x310   :  { %v448_v12 = vpop.permute.xlu0 %447 }
 0x311   :  { %v449_v13 = vunpack.i.l.bf16 %v448_v12  ;;  %v450_v14 = vunpack.i.h.bf16 %v448_v12 }
 0x313   :  { %319 = vmatpush.msra.mxu1 %v449_v13 }
 0x315   :  { %320 = vmatpush.msra.mxu1 %v450_v14 }
 0x319   :  { %123 = vperm.xlu1 %445, %v584_v15  }
 0x373   :  { %v265_v17 = vpop.xlane.xlu1 %264 }
 0x374   :  { %v266_v20 = vcvt.f32.s32 %v265_v17 }
 0x376   :  { %v588_v22 = vadd.s32 %v268_v19, %v266_v20 }
 0x378   :  { %v290_v23 = vadd.s32 %v289_v21, %v588_v22  ;;  %vm270_vm8 = vcmp.eq.s32.totalorder %v561_v30, %v588_v22 }
 0x37a   :  { %vm291_vm7 = vcmp.eq.s32.totalorder %v561_v30, %v290_v23 }
 0x37b   :  { %v292_v25 = vsel %vm291_vm7, 1.0, %v503_v24 }
 0x37c   :  { %428 = vmatmul.msk.f32.vlgmr.msra.gmra.mxu1 %vm301_vm6, %v292_v25 }
 0x38b   :  { %v124_v45 = vpop.permute.xlu1 %123 }
 0x38c   :  { %v128_v47 = vperm.slane %v124_v45, %v561_v30 }
 0x3f9   :  { %v322_v26 = vpop.f32.mrf.mxu1 }
 0x3fa   :  { %v326_v27 = vrot.slane %v322_v26, 1  ;;  %v327_v28 = vperm.slane %v322_v26, 0 }
 0x3fc   :  { %v328_v29 = vperm.slane %v326_v27, 0  ;;  %v331_v31 = vmul.f32 %v327_v28, %v536_v7 }
 0x3fe   :  { %v333_v32 = vsel %vm37_vm0, %v331_v31, 0.0  ;;  %v332_v9 = vmul.f32 %v328_v29, %v531_v6 }
 0x3ff   :  { %334 = vadd.xlane.f32.xlu2 %v333_v32 }
 0x400   :  { %v336_v33 = vsel %vm37_vm0, %v332_v9, 0.0 }
 0x401   :  { %337 = vadd.xlane.f32.xlu0 %v336_v33 }
 0x417   :  { %378 = vrot.lane.b32.xlu2 %v551_v18, %s504_s24 }
 0x41f   :  { %126 = vperm.xlu2 %444, %v601_v37  }
 0x472   :  { %v335_v7 = vpop.xlane.xlu2 %334 }
 0x473   :  { %v341_v39 = vperm.slane %v335_v7, %v561_v30 }
 0x474   :  { %v338_v6 = vpop.xlane.xlu0 %337 }
 0x475   :  { %v342_v40 = vperm.slane %v338_v6, %v561_v30 }
 0x477   :  { %v343_v38 = vsel %vm102_vm1, %v342_v40, %v341_v39 }
 0x478   :  { %v345_v18 = vsel %vm270_vm8, -1e+30, %v343_v38 }
 0x479   :  { %v346_v41 = vsel %vm105_vm2, %v345_v18, -inf }
 0x47a   :  { %347 = vmax.xlane.f32.xlu0 %v346_v41  ;;  %v379_v42 = vpop.permute.xlu2 %378 }
 0x47b   :  { %v381_v43 = vadd.f32 %v379_v42, %v345_v18 }
 0x47d   :  { %v382_v44 = vsel %vm105_vm2, %v381_v43, -inf }
 0x47e   :  { %383 = vmax.xlane.f32.xlu2 %v382_v44 }
 0x482   :  { %v127_v46 = vpop.permute.xlu2 %126 }
 0x483   :  { %v129_v48 = vperm.slane %v127_v46, %v561_v30 }
 0x485   :  { %v130_v49 = vsel %vm102_vm1, %v129_v48, %v128_v47 }
 0x486   :  { %v132_v50 = vsel %vm105_vm2, %v130_v49, 0.0 }
 0x487   :  { %133 = vadd.xlane.f32.xlu1 %v132_v50 }
 0x4ed   :  { %v348_v8 = vpop.xlane.xlu0 %347 }
 0x4ee   :  { %v349_v11 = vsub.f32 %v345_v18, %v348_v8 }
 0x4f0   :  { %v350_v13 = vmul.f32 1.442695, %v349_v11 }
 0x4f1   :  { %v384_v5 = vpop.xlane.xlu2 %383 }
 0x4f2   :  { %vm385_vm13 = vcmp.ge.f32.partialorder %v381_v43, %v384_v5 }
 0x4fa   :  { %v134_v51 = vpop.xlane.xlu1 %133 }
 0x4fb   :  { %460 = vlog2.f32 %v134_v51  ;;  %v145_v52 = vperm.slane %v134_v51, 0  ;;  %v146_v21 = vperm.slane %v134_v51, 1 }
 0x4fd   :  { %462 = vrcp.f32 %v145_v52  ;;  %v160_v60 = vand.u32 2147483648, %v145_v52  ;;  %v158_v62 = vand.u32 2147483647, %v145_v52  ;;  %vm154_vm10 = vweird.f32 %v145_v52 }
 0x4fe   :  { %464 = vpow2.f32 %v350_v13  ;;  %v175_v34 = vand.u32 2147483648, %v146_v21  ;;  %vm169_vm0 = vweird.f32 %v146_v21 }
 0x4ff   :  { %v161_v0 = vor.u32 1.1754944e-38, %v160_v60  ;;  %vm159_vm12 = vcmp.eq.f32.partialorder %v158_v62, 8.507059e+37  ;;  %466 = vrcp.f32 %v146_v21 }
 0x500   :  { %v176_v39 = vor.u32 1.1754944e-38, %v175_v34 }
 0x501   :  { %v461_v53 = vpop.eup %460 }
 0x502   :  { %v136_v54 = vmul.f32 0.6931472, %v461_v53 }
 0x503   :  { %v463_v55 = vpop.eup %462 }
 0x504   :  { %v150_v56 = vmul.f32 %v463_v55, %v145_v52  ;;  %v138_v57 = vperm.slane %v136_v54, 0  ;;  %vm155_vm9 = vweird.f32 %v463_v55  ;;  %v465_v17 = vpop.eup %464 }
 0x505   :  { %vm156_vm11 = vmor %vm154_vm10, %vm155_vm9  ;;  %v352_v19 = vsel %vm105_vm2, %v465_v17, 0.0  ;;  %v467_v24 = vpop.eup %466  ;;  %vm410_vm10 = vcmask 7168  }
 0x506   :  { %v151_v58 = vsub.f32 1.0, %v150_v56  ;;  %v142_v59 = vsub.f32 %v581_v10, %v138_v57  ;;  %v386_v10 = vsel %vm385_vm13, %v561_v30, 8  ;;  %v165_v26 = vmul.f32 %v467_v24, %v146_v21 }
 0x507   :  { %v387_v12 = vsel %vm105_vm2, %v386_v10, 2147483647  ;;  %vm170_vm15 = vweird.f32 %v467_v24  ;;  %vm416_vm13 = vcmask 31744  }
 0x508   :  { %274 = vperm.xlu1 %445, %v142_v59   ;;  %v152_v61 = vmul.f32 %v463_v55, %v151_v58  ;;  %v389_v14 = vshra.s32 %v387_v12, 16  ;;  %v388_v25 = vand.u32 65535, %v387_v12  ;;  %v166_v31 = vsub.f32 1.0, %v165_v26  ;;  %vm171_vm3 = vmor %vm169_vm0, %vm170_vm15 }
 0x50a   :  { %v153_v63 = vadd.f32 %v463_v55, %v152_v61  ;;  %v391_v16 = vcvt.s32.f32 %v389_v14  ;;  %v390_v28 = vcvt.s32.f32 %v388_v25  ;;  %v167_v32 = vmul.f32 %v467_v24, %v166_v31 }
 0x50c   :  { %v157_v1 = vsel %vm156_vm11, %v463_v55, %v153_v63  ;;  %v168_v33 = vadd.f32 %v467_v24, %v167_v32  ;;  %vm412_vm11 = vcmask 15360  }
 0x50d   :  { %v162_v2 = vsel %vm159_vm12, %v161_v0, %v157_v1  ;;  %vm414_vm12 = vcmask 23552  }
 0x50e   :  { %v163_v3 = vmul.f32 %v584_v15, %v162_v2  ;;  %v139_v15 = vperm.slane %v136_v54, 1  ;;  %v172_v7 = vsel %vm171_vm3, %v467_v24, %v168_v33  ;;  %v407_v2 = vcvt.s32.f32 %v588_v22 }
 0x510   :  { %v179_v4 = vmul.f32 %v163_v3, %v142_v59  ;;  %v143_v20 = vsub.f32 %v597_v35, %v139_v15  ;;  %v173_v35 = vand.u32 2147483647, %v146_v21 }
 0x512   :  { %184 = vperm.xlu0 %451, %v179_v4   ;;  %vm174_vm4 = vcmp.eq.f32.partialorder %v173_v35, 8.507059e+37 }
 0x513   :  { %v177_v38 = vsel %vm174_vm4, %v176_v39, %v172_v7 }
 0x514   :  { %v178_v44 = vmul.f32 %v601_v37, %v177_v38 }
 0x516   :  { %v180_v50 = vmul.f32 %v178_v44, %v143_v20 }
 0x53c   :  { %392 = vmin.xlane.f32.xlu0 %v391_v16 }
 0x544   :  { %353 = vadd.xlane.f32.xlu0 %v352_v19 }
 0x558   :  { %277 = vperm.xlu0 %451, %v143_v20  }
 0x57a   :  { %v275_v49 = vpop.permute.xlu1 %274 }
 0x57b   :  { %v279_v55 = vperm.slane %v275_v49, %v561_v30 }
 0x584   :  { %v624_v23 = vpop.permute.xlu0 %184 }
 0x585   :  { %v189_v8 = vperm.slane %v624_v23, %v561_v30 }
 0x5af   :  { %v393_v27 = vpop.xlane.xlu0 %392 }
 0x5b0   :  { %vm394_vm14 = vcmp.eq.f32.partialorder %v391_v16, %v393_v27  ;;  %v399_v61 = vcvt.f32.s32 %v393_v27 }
 0x5b1   :  { %v395_v29 = vsel %vm394_vm14, %v390_v28, inf }
 0x5b2   :  { %396 = vmin.xlane.f32.xlu2 %v395_v29  ;;  %v400_v63 = vshll.u32 %v399_v61, 16 }
 0x5b7   :  { %v354_v9 = vpop.xlane.xlu0 %353 }
 0x5b8   :  { %468 = vrcp.f32 %v354_v9  ;;  %v369_v41 = vand.u32 2147483648, %v354_v9  ;;  %v367_v43 = vand.u32 2147483647, %v354_v9  ;;  %vm363_vm6 = vweird.f32 %v354_v9 }
 0x5b9   :  { %470 = vlog2.f32 %v354_v9 }
 0x5ba   :  { %v370_v47 = vor.u32 1.1754944e-38, %v369_v41  ;;  %vm368_vm9 = vcmp.eq.f32.partialorder %v367_v43, 8.507059e+37 }
 0x5be   :  { %v469_v36 = vpop.eup %468 }
 0x5bf   :  { %v359_v6 = vmul.f32 %v469_v36, %v354_v9  ;;  %v471_v18 = vpop.eup %470  ;;  %vm364_vm5 = vweird.f32 %v469_v36 }
 0x5c0   :  { %v356_v45 = vmul.f32 0.6931472, %v471_v18  ;;  %vm365_vm7 = vmor %vm363_vm6, %vm364_vm5 }
 0x5c1   :  { %v360_v40 = vsub.f32 1.0, %v359_v6 }
 0x5c2   :  { %v357_v52 = vsub.f32 %v349_v11, %v356_v45 }
 0x5c3   :  { %v361_v42 = vmul.f32 %v469_v36, %v360_v40 }
 0x5c5   :  { %v362_v46 = vadd.f32 %v469_v36, %v361_v42 }
 0x5c7   :  { %v366_v48 = vsel %vm365_vm7, %v469_v36, %v362_v46 }
 0x5c8   :  { %v371_v51 = vsel %vm368_vm9, %v370_v47, %v366_v48 }
 0x5c9   :  { %v372_v53 = vmul.f32 %v465_v17, %v371_v51 }
 0x5ca   :  { %v278_v54 = vpop.permute.xlu0 %277  ;;  %187 = vperm.xlu2 %444, %v180_v50  }
 0x5cb   :  { %v280_v56 = vperm.slane %v278_v54, %v561_v30  ;;  %v373_v57 = vmul.f32 %v372_v53, %v357_v52 }
 0x5cd   :  { %v374_v37 = vsel %vm105_vm2, %v373_v57, 0.0  ;;  %v281_v58 = vsel %vm102_vm1, %v280_v56, %v279_v55 }
 0x5ce   :  { %375 = vadd.xlane.f32.xlu1 %v374_v37  ;;  %v283_v59 = vsel %vm270_vm8, %v281_v58, 0.0 }
 0x5cf   :  { %v284_v60 = vsel %vm105_vm2, %v283_v59, 0.0 }
 0x5d0   :  { %285 = vadd.xlane.f32.xlu0 %v284_v60 }
 0x625   :  { %v397_v62 = vpop.xlane.xlu2 %396 }
 0x626   :  { %v398_v0 = vcvt.f32.s32 %v397_v62 }
 0x628   :  { %v401_v1 = vadd.s32 %v400_v63, %v398_v0 }
 0x62a   :  { %v408_v3 = vcvt.s32.f32 %v401_v1  ;;  %vm402_vm8 = vcmp.eq.s32.totalorder %v561_v30, %v401_v1 }
 0x62b   :  { %v403_v13 = vsel %vm402_vm8, %v357_v52, 0.0 }
 0x62c   :  { %v411_v4 = vsel %vm410_vm10, %v407_v2, %v408_v3  ;;  %v404_v14 = vsel %vm105_vm2, %v403_v13, 0.0 }
 0x62d   :  { %v188_v5 = vpop.permute.xlu2 %187 }
 0x62e   :  { %v190_v10 = vperm.slane %v188_v5, %v561_v30 }
 0x630   :  { %v191_v11 = vsel %vm102_vm1, %v190_v10, %v189_v8  ;;  %vm418_vm1 = vcmask 39936  }
 0x631   :  { %v193_v12 = vsel %vm105_vm2, %v191_v11, 0.0 }
 0x632   :  { %194 = vadd.xlane.f32.xlu2 %v193_v12 }
 0x63a   :  { %405 = vadd.xlane.f32.xlu2 %v404_v14 }
 0x641   :  { %v376_v16 = vpop.xlane.xlu1 %375 }
 0x642   :  { %v377_v15 = vsub.f32 0.0, %v376_v16 }
 0x643   :  { %v286_v19 = vpop.xlane.xlu0 %285 }
 0x644   :  { %v413_v20 = vsel %vm412_vm11, %v411_v4, %v286_v19 }
 0x6a5   :  { %v195_v22 = vpop.xlane.xlu2 %194 }
 0x6a6   :  { %v196_v17 = vsub.f32 0.0, %v195_v22 }
 0x6a8   :  { %v409_v21 = vadd.f32 %v377_v15, %v196_v17 }
 0x6ad   :  { %v406_v23 = vpop.xlane.xlu2 %405 }
 0x6ae   :  { %v415_v24 = vsel %vm414_vm12, %v413_v20, %v406_v23 }
 0x6af   :  { %v417_v25 = vsel %vm416_vm13, %v415_v24, %v409_v21 }
 0x6b0   :  { %v419_v26 = vsel %vm418_vm1, %v417_v25, 0.0 }
 0x6b1   :  { %420 = vst.msk [vmem:[%s650_s3] sm:$0x3] %vm105_vm2, %v419_v26 }
 0x6b2   :  { %425 = vsyncpa [#allocation3], 1 }

</bundles_post_ra>
